<compile_context>
chip_gen: v7x
topology: tpu7x:2x2x1
jax: 0.10.0
libtpu: 0.0.40
codegen_flags: <defaults>
</compile_context>

<pallas_src>
import jax
import jax.numpy as jnp
from jax.experimental import pallas as pl
from jax.experimental.pallas import tpu as pltpu


def _attention_critic_kernel(st_ref, d1_ref, g_ref,
                             ws_ref, bs_ref, w1s_ref, w2d_ref, v_ref,
                             sh_ref, prob_ref):
    st = st_ref[0]                      # (Cs, T)  static columns for this (b, tile)
    d1 = d1_ref[0]                      # (1, T)   dynamic[:, 1] columns
    g = g_ref[0]                        # (H, 1)   per-batch W3@hy + W1@bs + W2@bd
    ws = ws_ref[...]                    # (H, Cs)  static encoder weight
    w1s = w1s_ref[...]                  # (H, Cs)  W1 @ Ws (folded)

    # static_hidden = Ws @ st + bs and the W1 @ static_hidden term of the
    # attention pre-activation, both as unrolled VPU outer-product FMAs
    # (K = Cs is tiny; the MXU at <1% utilization would only add latency).
    sh = bs_ref[...]                                    # (H, 1) -> broadcasts over T
    pre = g + w2d_ref[...] * d1                         # hy-term + rank-1 dynamic branch
    for c in range(st.shape[0]):                        # trace-time unrolled (Cs iters)
        col = st[c:c + 1, :]                            # (1, T)
        sh = sh + ws[:, c:c + 1] * col
        pre = pre + w1s[:, c:c + 1] * col

    t = jnp.tanh(pre)                                   # (H, T)

    sh_ref[0] = sh.astype(sh_ref.dtype)
    # prob = v @ tanh(...) as VPU multiply + sublane reduction.
    prob_ref[0] = jnp.sum(v_ref[...] * t, axis=0, keepdims=True).astype(prob_ref.dtype)


def attention_critic(hy, static, dynamic, params, *, max_tile=8192):
    """hy: (B, H), static: (B, Cs, S), dynamic: (B, Cd, S)
       -> (static_hidden (B, H, S), prob (B, 1, S))"""
    B, Cs, S = static.shape
    H = hy.shape[1]

    Ws, bs = params["Ws"], params["bs"]
    Wd, bd = params["Wd"], params["bd"]
    v_col = params["v"].reshape(H, 1)                      # (H, 1)
    W = params["W"]                                        # (H, 3H)
    W1, W2, W3 = W[:, :H], W[:, H:2 * H], W[:, 2 * H:]

    # --- trace-time folds (tiny, grid-invariant) ------------------------------
    W1s = W1 @ Ws                                          # (H, Cs)   W1 @ static enc
    w2d = W2 @ jnp.sum(Wd, axis=1, keepdims=True)          # (H, 1)    rank-1 dynamic fold
    const = W1 @ bs + W2 @ bd                              # (H, 1)    folded biases
    Ghy = (W3 @ hy.T + const).T[:, :, None]                # (B, H, 1) per-batch hy-term

    # --- per-batch lane-dense tiling of the sequence axis ---------------------
    S128 = ((S + 127) // 128) * 128
    T = min(int(max_tile), S128)
    T = ((T + 127) // 128) * 128                           # lane tile, multiple of 128
    S_pad = ((S + T - 1) // T) * T
    pad = S_pad - S

    st = static                                            # (B, Cs, S)
    d1 = dynamic[:, 1:2, :]                                # (B, 1, S)
    if pad:
        st = jnp.pad(st, ((0, 0), (0, 0), (0, pad)))
        d1 = jnp.pad(d1, ((0, 0), (0, 0), (0, pad)))

    grid = (B, S_pad // T)

    grid_spec = pl.GridSpec(
        grid=grid,
        in_specs=[
            pl.BlockSpec((1, Cs, T), lambda b, j: (b, 0, j)),   # static columns
            pl.BlockSpec((1, 1, T), lambda b, j: (b, 0, j)),    # dynamic[:,1] columns
            pl.BlockSpec((1, H, 1), lambda b, j: (b, 0, 0)),    # per-batch hy/bias term
            pl.BlockSpec((H, Cs), lambda b, j: (0, 0)),         # Ws
            pl.BlockSpec((H, 1), lambda b, j: (0, 0)),          # bs
            pl.BlockSpec((H, Cs), lambda b, j: (0, 0)),         # W1 @ Ws
            pl.BlockSpec((H, 1), lambda b, j: (0, 0)),          # W2 @ rowsum(Wd)
            pl.BlockSpec((H, 1), lambda b, j: (0, 0)),          # v
        ],
        out_specs=(
            pl.BlockSpec((1, H, T), lambda b, j: (b, 0, j)),    # static_hidden (B,H,S)
            pl.BlockSpec((1, 1, T), lambda b, j: (b, 0, j)),    # prob (B,1,S)
        ),
    )

    N = B * S_pad
    cost = pl.CostEstimate(
        flops=(4 * Cs + 5) * H * N,
        transcendentals=H * N,
        bytes_accessed=4 * N * (Cs + 1 + H + 1) + 4 * B * H,
    )

    sh_out, prob_out = pl.pallas_call(
        _attention_critic_kernel,
        out_shape=(jax.ShapeDtypeStruct((B, H, S_pad), jnp.float32),
                   jax.ShapeDtypeStruct((B, 1, S_pad), jnp.float32)),
        grid_spec=grid_spec,
        compiler_params=pltpu.CompilerParams(
            dimension_semantics=("parallel", "parallel")),
        cost_estimate=cost,
    )(st, d1, Ghy, Ws, bs, W1s, w2d, v_col)

    # Already in the PyTorch NCW layout; just drop the lane padding.
    return sh_out[:, :, :S], prob_out[:, :, :S]


def reference_forward(hy, static, dynamic, params):
    """Pure-JAX reference mirroring the PyTorch forward."""
    sh = jnp.einsum('hc,bcs->bhs', params["Ws"], static) + params["bs"][None, :, :]
    dyn_ld = jnp.broadcast_to(dynamic[:, 1:2, :], dynamic.shape)
    dh = jnp.einsum('hc,bcs->bhs', params["Wd"], dyn_ld) + params["bd"][None, :, :]
    B, H, S = sh.shape
    hyb = jnp.broadcast_to(hy[:, :, None], (B, H, S))
    hidden = jnp.concatenate([sh, dh, hyb], axis=1)          # (B, 3H, S)
    t = jnp.tanh(jnp.einsum('hk,bks->bhs', params["W"], hidden))
    prob = jnp.einsum('oh,bhs->bos', params["v"], t)          # (B, 1, S)
    return sh, prob


if __name__ == "__main__":
    # Small shapes consistent with the module's forward:
    B, S = 2, 8            # batch, seq
    Cs, Cd = 2, 3          # static_size, dynamic_size (dynamic needs >= 2 channels)
    H = 32                 # hidden_size

    key = jax.random.PRNGKey(0)
    ks = jax.random.split(key, 11)

    hy = jax.random.normal(ks[0], (B, H), jnp.float32)
    static = jax.random.normal(ks[1], (B, Cs, S), jnp.float32)
    dynamic = jax.random.normal(ks[2], (B, Cd, S), jnp.float32)

    params = {
        "Ws": jax.random.normal(ks[3], (H, Cs), jnp.float32) * 0.1,   # static encoder conv1d(k=1)
        "bs": jax.random.normal(ks[4], (H, 1), jnp.float32) * 0.1,
        "Wd": jax.random.normal(ks[5], (H, Cd), jnp.float32) * 0.1,   # dynamic encoder conv1d(k=1)
        "bd": jax.random.normal(ks[6], (H, 1), jnp.float32) * 0.1,
        "v": jax.random.normal(ks[7], (1, H), jnp.float32) * 0.1,     # nn.Parameter (1,1,H) -> (1,H)
        "W": jax.random.normal(ks[8], (H, 3 * H), jnp.float32) * 0.1, # nn.Parameter (1,H,3H) -> (H,3H)
    }

    static_hidden, prob = attention_critic(hy, static, dynamic, params)
    jax.block_until_ready((static_hidden, prob))

    sh_ref, prob_ref = reference_forward(hy, static, dynamic, params)
    assert static_hidden.shape == (B, H, S)
    assert prob.shape == (B, 1, S)
    assert jnp.allclose(static_hidden, sh_ref, rtol=1e-5, atol=1e-5)
    assert jnp.allclose(prob, prob_ref, rtol=1e-5, atol=1e-5)

    # Multi-tile / padded-tail check (forces several sequence tiles per batch,
    # exercising the 2-D grid index maps and the batch-boundary guarantee).
    S2 = 300
    static2 = jax.random.normal(ks[9], (B, Cs, S2), jnp.float32)
    dynamic2 = jax.random.normal(ks[10], (B, Cd, S2), jnp.float32)
    sh2, p2 = attention_critic(hy, static2, dynamic2, params, max_tile=128)
    jax.block_until_ready((sh2, p2))
    sh2_ref, p2_ref = reference_forward(hy, static2, dynamic2, params)
    assert jnp.allclose(sh2, sh2_ref, rtol=1e-5, atol=1e-5)
    assert jnp.allclose(p2, p2_ref, rtol=1e-5, atol=1e-5)

    print("KERNEL_OK")
</pallas_src>

<mosaic_0001>
module attributes {stable_mosaic.version = 11 : i64} {
  func.func @_attention_critic_kernel(%arg0: i32, %arg1: i32, %arg2: memref<1x2x128xf32, #tpu.memory_space<vmem>>, %arg3: memref<1x1x128xf32, #tpu.memory_space<vmem>>, %arg4: memref<1x32x1xf32, #tpu.memory_space<vmem>>, %arg5: memref<32x2xf32, #tpu.memory_space<vmem>>, %arg6: memref<32x1xf32, #tpu.memory_space<vmem>>, %arg7: memref<32x2xf32, #tpu.memory_space<vmem>>, %arg8: memref<32x1xf32, #tpu.memory_space<vmem>>, %arg9: memref<32x1xf32, #tpu.memory_space<vmem>>, %arg10: memref<1x32x128xf32, #tpu.memory_space<vmem>>, %arg11: memref<1x1x128xf32, #tpu.memory_space<vmem>>) attributes {dimension_semantics = [#tpu.dimension_semantics<parallel>, #tpu.dimension_semantics<parallel>], iteration_bounds = array<i64: 2, 1>, scalar_prefetch = 0 : i64, scratch_operands = 0 : i64, tpu.core_type = #tpu.core_type<tc>, window_params = [{transform_indices = @transform_0, window_bounds = array<i64: 1, 2, 128>}, {transform_indices = @transform_1, window_bounds = array<i64: 1, 1, 128>}, {transform_indices = @transform_2, window_bounds = array<i64: 1, 32, 1>}, {pipeline_mode = #tpu.pipeline_mode<synchronous>, transform_indices = @transform_3, window_bounds = array<i64: 32, 2>}, {pipeline_mode = #tpu.pipeline_mode<synchronous>, transform_indices = @transform_4, window_bounds = array<i64: 32, 1>}, {pipeline_mode = #tpu.pipeline_mode<synchronous>, transform_indices = @transform_5, window_bounds = array<i64: 32, 2>}, {pipeline_mode = #tpu.pipeline_mode<synchronous>, transform_indices = @transform_6, window_bounds = array<i64: 32, 1>}, {pipeline_mode = #tpu.pipeline_mode<synchronous>, transform_indices = @transform_7, window_bounds = array<i64: 32, 1>}, {transform_indices = @transform_8, window_bounds = array<i64: 1, 32, 128>}, {transform_indices = @transform_9, window_bounds = array<i64: 1, 1, 128>}]} {
    %c0 = arith.constant 0 : index
    %c0_0 = arith.constant 0 : index
    %c0_1 = arith.constant 0 : index
    %0 = vector.load %arg2[%c0, %c0_0, %c0_1] : memref<1x2x128xf32, #tpu.memory_space<vmem>>, vector<1x2x128xf32>
    %1 = vector.shape_cast %0 : vector<1x2x128xf32> to vector<2x128xf32>
    %c0_2 = arith.constant 0 : index
    %c0_3 = arith.constant 0 : index
    %c0_4 = arith.constant 0 : index
    %2 = vector.load %arg3[%c0_2, %c0_3, %c0_4] : memref<1x1x128xf32, #tpu.memory_space<vmem>>, vector<1x1x128xf32>
    %3 = vector.shape_cast %2 : vector<1x1x128xf32> to vector<1x128xf32>
    %c0_5 = arith.constant 0 : index
    %c0_6 = arith.constant 0 : index
    %c0_7 = arith.constant 0 : index
    %4 = vector.load %arg4[%c0_5, %c0_6, %c0_7] : memref<1x32x1xf32, #tpu.memory_space<vmem>>, vector<1x32x1xf32>
    %5 = vector.shape_cast %4 : vector<1x32x1xf32> to vector<32x1xf32>
    %c0_8 = arith.constant 0 : index
    %c0_9 = arith.constant 0 : index
    %6 = vector.load %arg5[%c0_8, %c0_9] : memref<32x2xf32, #tpu.memory_space<vmem>>, vector<32x2xf32>
    %c0_10 = arith.constant 0 : index
    %c0_11 = arith.constant 0 : index
    %7 = vector.load %arg7[%c0_10, %c0_11] : memref<32x2xf32, #tpu.memory_space<vmem>>, vector<32x2xf32>
    %c0_12 = arith.constant 0 : index
    %c0_13 = arith.constant 0 : index
    %8 = vector.load %arg6[%c0_12, %c0_13] : memref<32x1xf32, #tpu.memory_space<vmem>>, vector<32x1xf32>
    %c0_14 = arith.constant 0 : index
    %c0_15 = arith.constant 0 : index
    %9 = vector.load %arg8[%c0_14, %c0_15] : memref<32x1xf32, #tpu.memory_space<vmem>>, vector<32x1xf32>
    %10 = vector.broadcast %9 : vector<32x1xf32> to vector<32x128xf32>
    %11 = vector.broadcast %3 : vector<1x128xf32> to vector<32x128xf32>
    %12 = arith.mulf %10, %11 : vector<32x128xf32>
    %13 = vector.broadcast %5 : vector<32x1xf32> to vector<32x128xf32>
    %14 = arith.addf %13, %12 : vector<32x128xf32>
    %15 = vector.extract_strided_slice %1 {offsets = [0, 0], sizes = [1, 128], strides = [1, 1]} : vector<2x128xf32> to vector<1x128xf32>
    %16 = vector.extract_strided_slice %6 {offsets = [0, 0], sizes = [32, 1], strides = [1, 1]} : vector<32x2xf32> to vector<32x1xf32>
    %17 = vector.broadcast %16 : vector<32x1xf32> to vector<32x128xf32>
    %18 = vector.broadcast %15 : vector<1x128xf32> to vector<32x128xf32>
    %19 = arith.mulf %17, %18 : vector<32x128xf32>
    %20 = vector.broadcast %8 : vector<32x1xf32> to vector<32x128xf32>
    %21 = arith.addf %20, %19 : vector<32x128xf32>
    %22 = vector.extract_strided_slice %7 {offsets = [0, 0], sizes = [32, 1], strides = [1, 1]} : vector<32x2xf32> to vector<32x1xf32>
    %23 = vector.broadcast %22 : vector<32x1xf32> to vector<32x128xf32>
    %24 = vector.broadcast %15 : vector<1x128xf32> to vector<32x128xf32>
    %25 = arith.mulf %23, %24 : vector<32x128xf32>
    %26 = arith.addf %14, %25 : vector<32x128xf32>
    %27 = vector.extract_strided_slice %1 {offsets = [1, 0], sizes = [1, 128], strides = [1, 1]} : vector<2x128xf32> to vector<1x128xf32>
    %28 = vector.extract_strided_slice %6 {offsets = [0, 1], sizes = [32, 1], strides = [1, 1]} : vector<32x2xf32> to vector<32x1xf32>
    %29 = vector.broadcast %28 : vector<32x1xf32> to vector<32x128xf32>
    %30 = vector.broadcast %27 : vector<1x128xf32> to vector<32x128xf32>
    %31 = arith.mulf %29, %30 : vector<32x128xf32>
    %32 = arith.addf %21, %31 : vector<32x128xf32>
    %33 = vector.extract_strided_slice %7 {offsets = [0, 1], sizes = [32, 1], strides = [1, 1]} : vector<32x2xf32> to vector<32x1xf32>
    %34 = vector.broadcast %33 : vector<32x1xf32> to vector<32x128xf32>
    %35 = vector.broadcast %27 : vector<1x128xf32> to vector<32x128xf32>
    %36 = arith.mulf %34, %35 : vector<32x128xf32>
    %37 = arith.addf %26, %36 : vector<32x128xf32>
    %38 = math.tanh %37 : vector<32x128xf32>
    %c0_16 = arith.constant 0 : index
    %c0_17 = arith.constant 0 : index
    %c0_18 = arith.constant 0 : index
    %39 = vector.load %arg10[%c0_16, %c0_17, %c0_18] : memref<1x32x128xf32, #tpu.memory_space<vmem>>, vector<1x32x128xf32>
    %40 = vector.shape_cast %39 : vector<1x32x128xf32> to vector<32x128xf32>
    %41 = vector.shape_cast %32 : vector<32x128xf32> to vector<1x32x128xf32>
    tpu.vector_store %arg10[%c0_16, %c0_17, %c0_18], %41 {strides = array<i32>} : memref<1x32x128xf32, #tpu.memory_space<vmem>>, vector<1x32x128xf32>,
    %c0_19 = arith.constant 0 : index
    %c0_20 = arith.constant 0 : index
    %42 = vector.load %arg9[%c0_19, %c0_20] : memref<32x1xf32, #tpu.memory_space<vmem>>, vector<32x1xf32>
    %43 = vector.broadcast %42 : vector<32x1xf32> to vector<32x128xf32>
    %44 = arith.mulf %43, %38 : vector<32x128xf32>
    %cst = arith.constant dense<0.000000e+00> : vector<128xf32>
    %45 = vector.multi_reduction <add>, %44, %cst [0] : vector<32x128xf32> to vector<128xf32>
    %46 = vector.shape_cast %45 : vector<128xf32> to vector<1x128xf32>
    %c0_21 = arith.constant 0 : index
    %c0_22 = arith.constant 0 : index
    %c0_23 = arith.constant 0 : index
    %47 = vector.load %arg11[%c0_21, %c0_22, %c0_23] : memref<1x1x128xf32, #tpu.memory_space<vmem>>, vector<1x1x128xf32>
    %48 = vector.shape_cast %47 : vector<1x1x128xf32> to vector<1x128xf32>
    %49 = vector.shape_cast %46 : vector<1x128xf32> to vector<1x1x128xf32>
    tpu.vector_store %arg11[%c0_21, %c0_22, %c0_23], %49 {strides = array<i32>} : memref<1x1x128xf32, #tpu.memory_space<vmem>>, vector<1x1x128xf32>,
    return
  }
  func.func @transform_0(%arg0: i32, %arg1: i32) -> (i32, i32, i32) {
    %c0_i32 = arith.constant 0 : i32
    %c0_i32_0 = arith.constant 0 : i32
    return %arg0, %c0_i32, %arg1 : i32, i32, i32
  }
  func.func @transform_1(%arg0: i32, %arg1: i32) -> (i32, i32, i32) {
    %c0_i32 = arith.constant 0 : i32
    %c0_i32_0 = arith.constant 0 : i32
    return %arg0, %c0_i32, %arg1 : i32, i32, i32
  }
  func.func @transform_2(%arg0: i32, %arg1: i32) -> (i32, i32, i32) {
    %c0_i32 = arith.constant 0 : i32
    %c0_i32_0 = arith.constant 0 : i32
    %c0_i32_1 = arith.constant 0 : i32
    return %arg0, %c0_i32, %c0_i32_0 : i32, i32, i32
  }
  func.func @transform_3(%arg0: i32, %arg1: i32) -> (i32, i32) {
    %c0_i32 = arith.constant 0 : i32
    %c0_i32_0 = arith.constant 0 : i32
    %c0_i32_1 = arith.constant 0 : i32
    return %c0_i32, %c0_i32_0 : i32, i32
  }
  func.func @transform_4(%arg0: i32, %arg1: i32) -> (i32, i32) {
    %c0_i32 = arith.constant 0 : i32
    %c0_i32_0 = arith.constant 0 : i32
    %c0_i32_1 = arith.constant 0 : i32
    return %c0_i32, %c0_i32_0 : i32, i32
  }
  func.func @transform_5(%arg0: i32, %arg1: i32) -> (i32, i32) {
    %c0_i32 = arith.constant 0 : i32
    %c0_i32_0 = arith.constant 0 : i32
    %c0_i32_1 = arith.constant 0 : i32
    return %c0_i32, %c0_i32_0 : i32, i32
  }
  func.func @transform_6(%arg0: i32, %arg1: i32) -> (i32, i32) {
    %c0_i32 = arith.constant 0 : i32
    %c0_i32_0 = arith.constant 0 : i32
    %c0_i32_1 = arith.constant 0 : i32
    return %c0_i32, %c0_i32_0 : i32, i32
  }
  func.func @transform_7(%arg0: i32, %arg1: i32) -> (i32, i32) {
    %c0_i32 = arith.constant 0 : i32
    %c0_i32_0 = arith.constant 0 : i32
    %c0_i32_1 = arith.constant 0 : i32
    return %c0_i32, %c0_i32_0 : i32, i32
  }
  func.func @transform_8(%arg0: i32, %arg1: i32) -> (i32, i32, i32) {
    %c0_i32 = arith.constant 0 : i32
    %c0_i32_0 = arith.constant 0 : i32
    return %arg0, %c0_i32, %arg1 : i32, i32, i32
  }
  func.func @transform_9(%arg0: i32, %arg1: i32) -> (i32, i32, i32) {
    %c0_i32 = arith.constant 0 : i32
    %c0_i32_0 = arith.constant 0 : i32
    return %arg0, %c0_i32, %arg1 : i32, i32, i32
  }
}

</mosaic_0001>

<bundles_post_ra>
// kernel: tpu_custom_call.1
= control target key start
LH: loop header
LB: loop body
LE: loop exit
PB: predicated region body
PF: predicated region fallthrough
CT: control target
= control target key end

     0   :  { %s1352_s0 = inlined_call_operand.vmem [shape: f32[2,2,128], index: 0, kind: input, shape index: {}]   ;;  %s1353_s1 = inlined_call_operand.vmem [shape: f32[2,1,128], index: 1, kind: input, shape index: {}]   ;;  %s1354_s2 = inlined_call_operand.vmem [shape: f32[2,32,1], index: 2, kind: input, shape index: {}]   ;;  %s1355_s3 = inlined_call_operand.vmem [shape: f32[32,2], index: 3, kind: input, shape index: {}]   ;;  %s1356_s4 = inlined_call_operand.vmem [shape: f32[32,1], index: 4, kind: input, shape index: {}]   ;;  %s1357_s5 = inlined_call_operand.vmem [shape: f32[32,2], index: 5, kind: input, shape index: {}]   ;;  %s1358_s6 = inlined_call_operand.vmem [shape: f32[32,1], index: 6, kind: input, shape index: {}]   ;;  %s1359_s7 = inlined_call_operand.vmem [shape: f32[32,1], index: 7, kind: input, shape index: {}]   ;;  %s1360_s8 = inlined_call_operand.hbm [shape: f32[2,32,128], index: 8, kind: output, shape index: {0}]   ;;  %s1361_s9 = inlined_call_operand.hbm [shape: f32[2,1,128], index: 9, kind: output, shape index: {1}]  }
   0x1   :  { %1362 = sst [smem:[#allocation8_spill]] %s1352_s0 }
   0x2   :  { %1363 = sst [smem:[#allocation9_spill]] %s1353_s1 }
   0x3   :  { %15 = vsyncpa [#allocation3], 0 }
   0x4   :  { %17 = vsyncpa [#allocation3 + $0x1], 0 }
   0x5   :  { %18 = vsyncpa [#allocation5], 0 }
   0x6   :  { %20 = vsyncpa [#allocation5 + $0x1], 0  ;;  %s1093_s30 = smov 0   ;;  %s1095_s10 = smov 0  }
   0x7   :  { %s1097_s11 = smov 0   ;;  %s1099_s12 = smov 0  }
   0x8   :  { %s1101_s13 = smov 0   ;;  %s1103_s14 = smov 0  }
   0x9 LB: > { %s825_s15 = sadd.s32 4294967295, %s1035_s14   ;;  %s826_s16 = sadd.s32 4294967294, %s1035_s14   ;;  %s1035_s14 = sphi %s1103_s14, %s26_s14   ;;  %s1031_s13 = sphi %s1101_s13, %s1374_s13   ;;  %s1027_s12 = sphi %s1099_s12, %s1373_s12   ;;  %s1023_s11 = sphi %s1097_s11, %s1372_s11   ;;  %s1019_s10 = sphi %s1095_s10, %s1371_s10   ;;  %s1015_s30 = sphi %s1093_s30, %s1370_s30  }
   0xa   : > { %s38_s17 = sadd.s32 1, %s1031_s13  ;;  %s234_s18 = sadd.s32 1, %s1023_s11 }
   0xb   : > { %p40_p0 = scmp.ge.s32.totalorder %s38_s17, 2  ;;  %p244_p1 = scmp.ne.s32.totalorder %s1023_s11, %s1019_s10 }
   0xc   : > { %p245_p2 = scmp.eq.s32.totalorder %s825_s15, 1  ;;  %p250_p3 = scmp.ne.s32.totalorder %s1019_s10, %s1015_s30 }
   0xd   : > { %s1376_s17 = smov (%p40_p0, %s38_s17), 0  ;;  %p251_p5 = scmp.eq.s32.totalorder %s826_s16, 1 }
   0xe   : > { %p1133_p4 = por %p245_p2, %p244_p1  ;;  %s229_s20 = ssub.s32 %s1031_s13, %s1376_s17 }
   0xf   : > { %p829_p6 = scmp.ge.s32.totalorder %s1035_s14, 1  ;;  %p232_p7 = scmp.eq.s32.totalorder %s229_s20, 0 }
  0x10   : > { %p1140_p8 = por %p251_p5, %p250_p3  ;;  %p339_p9 = scmp.lt.s32.totalorder %s1035_s14, 3 }
  0x11   : > { %s1146_s22 = scalar_select %p232_p7, %s1023_s11, %s234_s18  }
  0x12   : > { %p340_p10 = pnand %p829_p6, %p339_p9 }
  0x13   : > { %v430_v0 = vld [vmem:[%s1358_s6 + $0x10] sm:$0xff] (!%p340_p10)  ;;  %v420_v1 = vld [vmem:[%s1357_s5] sm:$0xff] (!%p340_p10)  ;;  %p392_p11 = scmp.lt.s32.totalorder (!%p340_p10), %s1027_s12, 1  ;;  %v1037_v2 = vmov (!%p340_p10), 1   ;;  %v1038_v3 = vmov (!%p340_p10), 0   ;;  %v431_v4 = vld [vmem:[%s1358_s6 + $0x18] sm:$0xff] (!%p340_p10)  ;;  %v506_v29 = vlaneseq (!%p340_p10) }
  0x14   : > { %343 = sbr.rel (%p340_p10) target bundleno = 258 (0x102), region = 52  ;;  %908 = vset.pattern.permute.xlu0 (!%p340_p10), %v1037_v2  ;;  %907 = vset.pattern.permute.xlu1 (!%p340_p10), %v1038_v3  ;;  %v428_v5 = vld [vmem:[%s1358_s6] sm:$0xff] (!%p340_p10)  ;;  %v429_v7 = vld [vmem:[%s1358_s6 + $0x8] sm:$0xff] (!%p340_p10)  ;;  %v422_v9 = vld [vmem:[%s1357_s5 + $0x10] sm:$0xff] (!%p340_p10)  ;;  %s1366_s0 = sld [smem:[#allocation8_spill]] (!%p340_p10) }
  0x15   : > { %444 = vperm.xlu1 (!%p340_p10), %907, %v430_v0   ;;  %595 = vperm.xlu0 (!%p340_p10), %908, %v420_v1   ;;  %v421_v11 = vld [vmem:[%s1357_s5 + $0x8] sm:$0xff] (!%p340_p10)  ;;  %v423_v12 = vld [vmem:[%s1357_s5 + $0x18] sm:$0xff] (!%p340_p10)  ;;  %v626_v14 = vld [vmem:[%s1359_s7] sm:$0xff] (!%p340_p10)  ;;  %v507_v32 = vshrl.u32 (!%p340_p10), %v506_v29, 7  ;;  %s1367_s1 = sld [smem:[#allocation9_spill]] (!%p340_p10)  ;;  %s838_s28 = sshll.u32 (!%p340_p10), %s1027_s12, 4 }
  0x16   : > { %v628_v15 = vld [vmem:[%s1359_s7 + $0x10] sm:$0xff] (!%p340_p10)  ;;  %v416_v16 = vld [vmem:[%s1355_s3] sm:$0xff] (!%p340_p10)  ;;  %v627_v17 = vld [vmem:[%s1359_s7 + $0x8] sm:$0xff] (!%p340_p10) }
  0x17   : > { %v418_v18 = vld [vmem:[%s1355_s3 + $0x10] sm:$0xff] (!%p340_p10)  ;;  %v629_v19 = vld [vmem:[%s1359_s7 + $0x18] sm:$0xff] (!%p340_p10)  ;;  %v424_v20 = vld [vmem:[%s1356_s4] sm:$0xff] (!%p340_p10)  ;;  %v508_v35 = vsub.s32 (!%p340_p10), 0, %v507_v32  ;;  %v584_v43 = vsub.s32 (!%p340_p10), 1, %v507_v32 }
  0x18   : > { %v417_v21 = vld [vmem:[%s1355_s3 + $0x8] sm:$0xff] (!%p340_p10)  ;;  %v426_v22 = vld [vmem:[%s1356_s4 + $0x10] sm:$0xff] (!%p340_p10)  ;;  %v419_v23 = vld [vmem:[%s1355_s3 + $0x18] sm:$0xff] (!%p340_p10) }
  0x19   : > { %449 = vperm.xlu1 (!%p340_p10), %907, %v431_v4   ;;  %909 = vset.pattern.permute.xlu0 (!%p340_p10), %v1038_v3  ;;  %v425_v24 = vld [vmem:[%s1356_s4 + $0x8] sm:$0xff] (!%p340_p10)  ;;  %v427_v25 = vld [vmem:[%s1356_s4 + $0x18] sm:$0xff] (!%p340_p10) }
  0x1a   : > { %434 = vperm.xlu0 (!%p340_p10), %909, %v428_v5  }
  0x1b   : > { %s1157_s27 = scalar_select %p392_p11, %s1027_s12, 1 }
  0x1d   : > { %s841_s18 = sshll.u32 %s1157_s27, 5  ;;  %s831_s29 = sshll.u32 %s1157_s27, 1 }
  0x1e   : > { %s409_s24 = scalar_lea.vmem %s1354_s2, %s841_s18  ;;  %439 = vperm.xlu0 %909, %v429_v7   ;;  %s398_s16 = scalar_lea.vmem %s1366_s0, %s831_s29 }
  0x1f   : > { %v413_v6 = vld [vmem:[%s409_s24 + $0x8] sm:$0xff]  ;;  %v412_v8 = vld [vmem:[%s409_s24] sm:$0xff]  ;;  %v414_v10 = vld [vmem:[%s409_s24 + $0x10] sm:$0xff]  ;;  %s404_s23 = scalar_lea.vmem %s1367_s1, %s1157_s27  ;;  %s1244_s27 = sand.u32 1, %s1019_s10  }
  0x20   : > { %469 = vperm.xlu1 %907, %v413_v6   ;;  %v415_v13 = vld [vmem:[%s409_s24 + $0x18] sm:$0xff]  ;;  %v410_v37 = vld [vmem:[%s398_s16] sm:$0x3]  ;;  %s830_s25 = sshll.u32 %s1244_s27, 5  ;;  %s391_s29 = scalar_lea.vmem [#allocation4], %s1244_s27 }
  0x21   : > { %v834_v38 = vld [vmem:[%s404_s23] ss:$0 sm:$0xff]  ;;  %v1229_v40 = vrot.slane %v410_v37, %v508_v35  ;;  %v1233_v50 = vrot.slane %v410_v37, %v584_v43  ;;  %s1250_s26 = scalar_lea.vmem [#allocation2], %s830_s25  ;;  %s700_s15 = sshll.u32 %s391_s29, 4  ;;  %s1263_s15 = int_to_ptr.vmem [resolvable:$true] %s700_s15 }
  0x22   : > { %464 = vperm.xlu0 %909, %v412_v8   ;;  %s1261_s18 = scalar_lea.hbm %s1361_s9, %s838_s28  ;;  %s670_s25 = scalar_lea.sflag [#allocation5], %s1244_s27 }
  0x23   : > { %s925_s0 = scalar_lea.vmem %s1263_s15, 16  ;;  %s1039_s28 = smov [#allocation4]  }
  0x24   : > { %540 = vperm.xlu1 %907, %v420_v1   ;;  %p926_p12 = scmp.ne.s32.totalorder %s1263_s15, %s925_s0  ;;  %s929_s24 = sshll.u32 %s1039_s28, 4  ;;  %s930_s24 = int_to_ptr.vmem [resolvable:$false] %s929_s24 }
  0x25   : > { %s931_s16 = scalar_lea.vmem %s930_s24, 32  ;;  %p932_p1 = scmp.lt.s32.totalorder %s1263_s15, %s930_s24 }
  0x26   : > { %474 = vperm.xlu0 %909, %v414_v10   ;;  %p927_p13 = pnand %p926_p12, %p1133_p4  ;;  %p933_p2 = scmp.lt.s32.totalorder %s931_s16, %s925_s0 }
  0x28   : > { %550 = vperm.xlu1 %907, %v422_v9   ;;  %p928_p0 = pneg %p927_p13  ;;  %p934_p3 = por %p933_p2, %p932_p1 }
  0x2a   : > { %545 = vperm.xlu0 %909, %v421_v11   ;;  %p935_p5 = pnand %p934_p3, %p928_p0 }
  0x2c   : > { %910 = vset.pattern.permute.xlu1 %v1037_v2 }
  0x2d   : > { %599 = vperm.xlu1 %910, %v421_v11  }
  0x2e   : > { %555 = vperm.xlu0 %909, %v423_v12  }
  0x31   : > { %911 = vset.pattern.permute.xlu1 %v1038_v3 }
  0x32   : > { %479 = vperm.xlu1 %911, %v415_v13   ;;  %632 = vperm.xlu0 %909, %v626_v14  }
  0x36   : > { %912 = vset.pattern.permute.xlu1 %v1037_v2  ;;  %642 = vperm.xlu0 %909, %v628_v15  }
  0x37   : > { %603 = vperm.xlu1 %912, %v422_v9  }
  0x3a   : > { %488 = vperm.xlu0 %909, %v416_v16  }
  0x3b   : > { %607 = vperm.xlu1 %912, %v423_v12  }
  0x3e   : > { %498 = vperm.xlu0 %909, %v418_v18  }
  0x3f   : > { %913 = vset.pattern.permute.xlu1 %v1038_v3 }
  0x40   : > { %637 = vperm.xlu1 %913, %v627_v17  }
  0x42   : > { %516 = vperm.xlu0 %909, %v424_v20  }
  0x44   : > { %647 = vperm.xlu1 %913, %v629_v19  }
  0x46   : > { %526 = vperm.xlu0 %909, %v426_v22  }
  0x48   : > { %493 = vperm.xlu1 %913, %v417_v21  }
  0x4a   : > { %914 = vset.pattern.permute.xlu0 %v1037_v2 }
  0x4b   : > { %567 = vperm.xlu0 %914, %v416_v16  }
  0x4c   : > { %503 = vperm.xlu1 %913, %v419_v23  }
  0x4f   : > { %579 = vperm.xlu0 %914, %v419_v23  }
  0x50   : > { %521 = vperm.xlu1 %913, %v425_v24  }
  0x53   : > { %916 = vset.pattern.permute.xlu0 %v1038_v3 }
  0x54   : > { %531 = vperm.xlu1 %913, %v427_v25  }
  0x58   : > { %915 = vset.pattern.permute.xlu1 %v1037_v2 }
  0x59   : > { %571 = vperm.xlu1 %915, %v417_v21  }
  0x5d   : > { %575 = vperm.xlu1 %915, %v418_v18  }
  0x94   : > { %v445_v26 = vpop.permute.xlu1 %444  ;;  %v596_v27 = vpop.permute.xlu0 %595 }
  0x95   : > { %v460_v54 = vmul.f32 %v834_v38, %v445_v26  ;;  %v610_v57 = vmul.f32 %v596_v27, %v1233_v50 }
  0x98   : > { %v450_v28 = vpop.permute.xlu1 %449 }
  0x99   : > { %v435_v30 = vpop.permute.xlu0 %434  ;;  %v461_v63 = vmul.f32 %v834_v38, %v450_v28 }
  0x9a   : > { %v458_v41 = vmul.f32 %v834_v38, %v435_v30 }
  0x9d   : > { %v440_v33 = vpop.permute.xlu0 %439 }
  0x9e   : > { %v459_v44 = vmul.f32 %v834_v38, %v440_v33 }
  0x9f   : > { %v470_v31 = vpop.permute.xlu1 %469 }
  0xa0   : > { %v483_v51 = vadd.f32 %v470_v31, %v459_v44 }
  0xa1   : > { %v465_v36 = vpop.permute.xlu0 %464 }
  0xa2   : > { %v482_v46 = vadd.f32 %v465_v36, %v458_v41 }
  0xa3   : > { %v541_v34 = vpop.permute.xlu1 %540 }
  0xa4   : > { %v558_v45 = vmul.f32 %v541_v34, %v1229_v40 }
  0xa5   : > { %v475_v42 = vpop.permute.xlu0 %474 }
  0xa6   : > { %v562_v52 = vadd.f32 %v558_v45, %v482_v46  ;;  %v484_v59 = vadd.f32 %v475_v42, %v460_v54 }
  0xa7   : > { %v551_v39 = vpop.permute.xlu1 %550 }
  0xa8   : > { %v560_v58 = vmul.f32 %v551_v39, %v1229_v40  ;;  %v614_v61 = vadd.f32 %v610_v57, %v562_v52 }
  0xa9   : > { %v546_v48 = vpop.permute.xlu0 %545 }
  0xaa   : > { %v559_v49 = vmul.f32 %v546_v48, %v1229_v40  ;;  %v564_v2 = vadd.f32 %v560_v58, %v484_v59  ;;  %917 = vtanh.f32 %v614_v61 }
  0xac   : > { %v600_v47 = vpop.permute.xlu1 %599  ;;  %v563_v55 = vadd.f32 %v559_v49, %v483_v51 }
  0xad   : > { %v556_v53 = vpop.permute.xlu0 %555  ;;  %v611_v60 = vmul.f32 %v600_v47, %v1233_v50 }
  0xae   : > { %v561_v3 = vmul.f32 %v556_v53, %v1229_v40 }
  0xaf   : > { %v615_v0 = vadd.f32 %v611_v60, %v563_v55 }
  0xb1   : > { %v480_v56 = vpop.permute.xlu1 %479  ;;  %v633_v62 = vpop.permute.xlu0 %632  ;;  %919 = vtanh.f32 %v615_v0 }
  0xb2   : > { %v485_v4 = vadd.f32 %v480_v56, %v461_v63 }
  0xb4   : > { %v565_v9 = vadd.f32 %v561_v3, %v485_v4  ;;  %v918_v15 = vpop.eup %917 }
  0xb5   : > { %v643_v6 = vpop.permute.xlu0 %642  ;;  %v650_v21 = vmul.f32 %v918_v15, %v633_v62 }
  0xb6   : > { %v604_v1 = vpop.permute.xlu1 %603 }
  0xb7   : > { %v612_v5 = vmul.f32 %v604_v1, %v1233_v50 }
  0xb9   : > { %v616_v7 = vadd.f32 %v612_v5, %v564_v2  ;;  %v489_v11 = vpop.permute.xlu0 %488 }
  0xba   : > { %v608_v8 = vpop.permute.xlu1 %607  ;;  %v510_v30 = vmul.f32 %v1229_v40, %v489_v11 }
  0xbb   : > { %921 = vtanh.f32 %v616_v7  ;;  %v613_v10 = vmul.f32 %v608_v8, %v1233_v50  ;;  %v920_v16 = vpop.eup %919 }
  0xbd   : > { %v617_v12 = vadd.f32 %v613_v10, %v565_v9  ;;  %v499_v14 = vpop.permute.xlu0 %498 }
  0xbe   : > { %v512_v55 = vmul.f32 %v1229_v40, %v499_v14 }
  0xbf   : > { %923 = vtanh.f32 %v617_v12  ;;  %v638_v13 = vpop.permute.xlu1 %637 }
  0xc0   : > { %v651_v18 = vmul.f32 %v920_v16, %v638_v13 }
  0xc1   : > { %v517_v19 = vpop.permute.xlu0 %516 }
  0xc2   : > { %v654_v24 = vadd.f32 %v651_v18, %v650_v21  ;;  %v534_v34 = vadd.f32 %v517_v19, %v510_v30 }
  0xc3   : > { %v648_v17 = vpop.permute.xlu1 %647 }
  0xc5   : > { %v922_v20 = vpop.eup %921  ;;  %v1241_v25 = vpop.permute.xlu0 %526 }
  0xc6   : > { %v652_v22 = vmul.f32 %v922_v20, %v643_v6 }
  0xc7   : > { %v494_v23 = vpop.permute.xlu1 %493 }
  0xc8   : > { %v655_v28 = vadd.f32 %v654_v24, %v652_v22  ;;  %v511_v49 = vmul.f32 %v1229_v40, %v494_v23 }
  0xc9   : > { %v924_v26 = vpop.eup %923 }
  0xca   : > { %v653_v27 = vmul.f32 %v924_v26, %v648_v17  ;;  %v568_v32 = vpop.permute.xlu0 %567 }
  0xcb   : > { %v504_v29 = vpop.permute.xlu1 %503  ;;  %v586_v35 = vmul.f32 %v1233_v50, %v568_v32 }
  0xcc   : > { %v656_v31 = vadd.f32 %v655_v28, %v653_v27  ;;  %v513_v42 = vmul.f32 %v1229_v40, %v504_v29 }
  0xcd   : > { %v590_v38 = vadd.f32 %v586_v35, %v534_v34 }
  0xce   : > { %v657_v33 = vrot.slane %v656_v31, 4  ;;  %v580_v39 = vpop.permute.xlu0 %579 }
  0xcf   : > { %v522_v36 = vpop.permute.xlu1 %521  ;;  %622 = vst [vmem:[%s1250_s26] sm:$0xff] %v590_v38  ;;  %v589_v43 = vmul.f32 %v1233_v50, %v580_v39 }
  0xd0   : > { %v658_v37 = vadd.f32 %v657_v33, %v656_v31  ;;  %v535_v53 = vadd.f32 %v522_v36, %v511_v49 }
  0xd2   : > { %v659_v41 = vrot.slane %v658_v37, 2 }
  0xd3   : > { %v532_v44 = vpop.permute.xlu1 %531 }
  0xd4   : > { %v660_v45 = vadd.f32 %v659_v41, %v658_v37  ;;  %v537_v46 = vadd.f32 %v532_v44, %v513_v42 }
  0xd6   : > { %v593_v47 = vadd.f32 %v589_v43, %v537_v46  ;;  %v661_v48 = vrot.slane %v660_v45, 1 }
  0xd8   : > { %625 = vst [vmem:[%s1250_s26 + $0x18] sm:$0xff] %v593_v47  ;;  %v572_v51 = vpop.permute.xlu1 %571  ;;  %v662_v52 = vadd.f32 %v661_v48, %v660_v45 }
  0xd9   : > { %v587_v54 = vmul.f32 %v1233_v50, %v572_v51 }
  0xda   : > { %663 = vst [vmem:[%s391_s29] sm:$0x1] %v662_v52 }
  0xdb   : > { %v591_v56 = vadd.f32 %v587_v54, %v535_v53 }
  0xdc   : > { %938 = shalt.err (!%p935_p5)
}
  0xdd   : > { %s939_s29 = scalar_lea.hbm %s1261_s18, 16  ;;  %s943_s28 = scalar_lea.hbm %s1361_s9, 32 }
  0xde   : > { %p940_p6 = scmp.ne.s32.totalorder %s1261_s18, %s939_s29  ;;  %p944_p10 = scmp.lt.u32.totalorder %s1261_s18, %s1361_s9 }
  0xdf   : > { %p945_p11 = scmp.lt.u32.totalorder %s943_s28, %s939_s29  ;;  %p947_p13 = scmp.lt.u32.totalorder %s939_s29, %s1261_s18 }
  0xe0   : > { %p941_p7 = pnand %p940_p6, %p1133_p4 }
  0xe1   : > { %p946_p12 = por %p945_p11, %p944_p10 }
  0xe2   : > { %p942_p9 = pneg %p941_p7 }
  0xe3   : > { %p948_p0 = por %p947_p13, %p946_p12 }
  0xe5   : > { %p949_p1 = pnand %p948_p0, %p942_p9 }
  0xe7   : > { %952 = shalt.err (!%p949_p1)
}
  0xe8   : > { %844 = dma.vmem_to_hbm [thread:$0]  (%p1133_p4), %s1263_s15, 16, %s1261_s18, %s670_s25   ;;  %v576_v40 = vpop.permute.xlu1 %575  ;;  %v536_v57 = vadd.f32 %v1241_v25, %v512_v55  ;;  %623 = vst [vmem:[%s1250_s26 + $0x8] sm:$0xff] %v591_v56 }
  0xe9   : > { %v588_v58 = vmul.f32 %v1233_v50, %v576_v40  ;;  %s1368_s0 = sshll.u32 %s1250_s26, 4  ;;  %s1369_s1 = sshll.u32 %s1027_s12, 9  ;;  %s1296_s0 = int_to_ptr.vmem [resolvable:$true] %s1368_s0 }
  0xea   : > { %s1303_s16 = scalar_lea.hbm %s1360_s8, %s1369_s1  ;;  %s665_s15 = scalar_lea.sflag [#allocation3], %s1244_s27 }
  0xeb   : > { %v592_v59 = vadd.f32 %v588_v58, %v536_v57  ;;  %s953_s18 = scalar_lea.vmem %s1296_s0, 512  ;;  %s1040_s25 = smov [#allocation2]  }
  0xec   : > { %p954_p2 = scmp.ne.s32.totalorder %s1296_s0, %s953_s18  ;;  %s957_s29 = sshll.u32 %s1040_s25, 4  ;;  %s958_s29 = int_to_ptr.vmem [resolvable:$false] %s957_s29 }
  0xed   : > { %624 = vst [vmem:[%s1250_s26 + $0x10] sm:$0xff] %v592_v59  ;;  %s959_s12 = scalar_lea.vmem %s958_s29, 1024  ;;  %p960_p6 = scmp.lt.s32.totalorder %s1296_s0, %s958_s29 }
  0xee   : > { %p955_p3 = pnand %p954_p2, %p1133_p4  ;;  %p961_p7 = scmp.lt.s32.totalorder %s959_s12, %s953_s18 }
  0xf0   : > { %p956_p5 = pneg %p955_p3  ;;  %p962_p9 = por %p961_p7, %p960_p6 }
  0xf2   : > { %p963_p10 = pnand %p962_p9, %p956_p5 }
  0xf4   : > { %966 = shalt.err (!%p963_p10)
}
  0xf5   : > { %s967_s26 = scalar_lea.hbm %s1303_s16, 512  ;;  %s971_s1 = scalar_lea.hbm %s1360_s8, 1024 }
  0xf6   : > { %p968_p11 = scmp.ne.s32.totalorder %s1303_s16, %s967_s26  ;;  %p972_p0 = scmp.lt.u32.totalorder %s1303_s16, %s1360_s8 }
  0xf7   : > { %p973_p1 = scmp.lt.u32.totalorder %s971_s1, %s967_s26  ;;  %p975_p3 = scmp.lt.u32.totalorder %s967_s26, %s1303_s16 }
  0xf8   : > { %p969_p12 = pnand %p968_p11, %p1133_p4 }
  0xf9   : > { %p974_p2 = por %p973_p1, %p972_p0 }
  0xfa   : > { %p970_p13 = pneg %p969_p12 }
  0xfb   : > { %p976_p5 = por %p975_p3, %p974_p2 }
  0xfd   : > { %p977_p6 = pnand %p976_p5, %p970_p13 }
  0xff   : > { %980 = shalt.err (!%p977_p6)
}
 0x100   : > { %s1041_s18 = smov 128   ;;  %s1042_s25 = smov 8  }
 0x101   : > { %843 = dma.vmem_to_hbm [thread:$0]  (%p1133_p4), %s1296_s0, 512, %s1303_s16, %s665_s15, %s1041_s18, %s1041_s18, %s1042_s25  }
 0x102 PF: > { %p854_p7 = scmp.ge.s32.totalorder %s1035_s14, 2  ;;  %s712_s29 = sand.u32 1, %s1015_s30  }
 0x103   : > { %s713_s12 = scalar_lea.sflag [#allocation3], %s712_s29 }
 0x104   : > { %p848_p9 = pnand %p854_p7, %p1140_p8 }
 0x106   : > { %1006 = dma.done.wait (!%p848_p9), %s713_s12, 512  }
 0x107   : > { %1008 = vsyncadd (!%p848_p9), %s713_s12, 4294966784  ;;  %s722_s26 = scalar_lea.sflag [#allocation5], %s712_s29 }
 0x108   : > { %1010 = dma.done.wait (!%p848_p9), %s722_s26, 16  }
 0x109   : > { %1012 = vsyncadd (!%p848_p9), %s722_s26, 4294967280  ;;  %s26_s14 = sadd.s32 1, %s1035_s14   ;;  %s1370_s30 = smov %s1019_s10 }
 0x10a   : > { %p23_p10 = scmp.ge.s32.totalorder %s26_s14, 4   ;;  %s1371_s10 = smov %s1023_s11 }
 0x10b   : > { %s1372_s11 = smov %s1146_s22  ;;  %s1373_s12 = smov %s1031_s13 }
 0x10c   : > { %s1374_s13 = smov %s1376_s17  ;;  %25 = sbr.rel (!%p23_p10) target bundleno = 9 (0x9), region = 110 }
 0x113   :  { %726 = vsyncpa [#allocation3], 1 }
 0x114   :  { %728 = vsyncpa [#allocation3 + $0x1], 1 }
 0x115   :  { %729 = vsyncpa [#allocation5], 1 }
 0x116   :  { %731 = vsyncpa [#allocation5 + $0x1], 1 }

</bundles_post_ra>
